<compile_context>
chip_gen: v7x
topology: tpu7x:2x2x1
jax: 0.10.0
libtpu: 0.0.40
codegen_flags: <defaults>
</compile_context>

<pallas_src>
import jax
import jax.numpy as jnp
from jax.experimental import pallas as pl
from jax.experimental.pallas import tpu as pltpu


def basic_conv2d_inc_res_2(x, weight, gamma, beta, running_mean, running_var,
                           *, stride, padding, eps=1e-3,
                           compute_dtype=jnp.bfloat16, out_dtype=jnp.float32):
    """Forward of BasicConv2d_inc_res_2 (conv -> eval-mode BN -> ReLU), fused on TPU."""
    # TODO(synk): training-mode BatchNorm (batch statistics + running-stat update) is not
    # implemented; eval-mode running-stats BN is applied as an f32 scale/shift epilogue.
    N, C, H, W = x.shape
    OUT, _, KH, KW = weight.shape
    s = int(stride)
    p = int(padding)
    Hp, Wp = H + 2 * p, W + 2 * p
    OH = (Hp - KH) // s + 1
    OW = (Wp - KW) // s + 1

    # Sublane-friendly channel padding (zero channels contribute nothing to the conv).
    Cp = pl.cdiv(C, 8) * 8
    OUTp = pl.cdiv(OUT, 8) * 8

    # Flat-shift geometry: for kernel tap (kh, kw) the conv is a matmul over channels
    # against the flattened padded image shifted by kh*Wp + kw lanes.  We compute every
    # stride-1 flat position in rows 0 .. (OH-1)*s; the KW-1 "wrap" columns per row are
    # garbage and are sliced off in the wrapper.
    # TODO(synk): stride > 1 computes all stride-1 columns and subsamples afterwards
    # (s^2 compute inflation); a strided in-kernel gather would avoid it.
    n_rows = (OH - 1) * s + 1                       # stride-1 image rows the kernel covers
    Lp = pl.cdiv(n_rows * Wp, 128) * 128            # lane-dense flat output length
    halo = (KH - 1) * Wp + (KW - 1)                 # largest lane shift used in the kernel
    Lin = pl.cdiv(max(Hp * Wp, Lp + halo), 128) * 128

    # --- wrapper-side prep: zero-pad + flatten only (no im2col, no transposes of x) ------
    xp = jnp.pad(x, ((0, 0), (0, Cp - C), (p, p), (p, p)))
    xflat = xp.reshape(N, Cp, Hp * Wp)
    xflat = jnp.pad(xflat, ((0, 0), (0, 0), (0, Lin - Hp * Wp))).astype(compute_dtype)

    wk = jnp.pad(weight, ((0, OUTp - OUT), (0, Cp - C), (0, 0), (0, 0)))
    wk = wk.transpose(2, 3, 0, 1).reshape(KH * KW, OUTp, Cp).astype(compute_dtype)

    # Eval-mode BatchNorm as per-channel f32 scale/shift, applied in the f32 epilogue.
    scale = (gamma / jnp.sqrt(running_var + eps)).astype(jnp.float32)
    shift = (beta - running_mean * scale).astype(jnp.float32)
    scale = jnp.pad(scale, (0, OUTp - OUT)).reshape(OUTp, 1)
    shift = jnp.pad(shift, (0, OUTp - OUT)).reshape(OUTp, 1)

    def kernel(w_ref, scale_ref, shift_ref, x_ref, o_ref):
        # w_ref:     (KH*KW, OUTp, Cp)  conv taps
        # scale_ref: (OUTp, 1) f32      BN scale
        # shift_ref: (OUTp, 1) f32      BN shift
        # x_ref:     (Cp, Lin)          flattened zero-padded image (row-major Hp x Wp)
        # o_ref:     (OUTp, Lp)         flat stride-1 conv output (lane-dense)
        acc = None
        for kh in range(KH):            # in-kernel im2col: KH*KW shifted-window matmuls,
            for kw in range(KW):        # unrolled; f32 accumulation on the MXU
                off = kh * Wp + kw      # static lane shift
                xs = x_ref[:, off:off + Lp]                       # (Cp, Lp) shifted window
                part = jnp.dot(w_ref[kh * KW + kw], xs,
                               preferred_element_type=jnp.float32)
                acc = part if acc is None else acc + part
        y = acc * scale_ref[...] + shift_ref[...]                 # BN (f32 epilogue)
        o_ref[...] = jnp.maximum(y, 0.0).astype(o_ref.dtype)      # ReLU + cast

    out = pl.pallas_call(
        kernel,
        out_shape=jax.ShapeDtypeStruct((N, OUTp, Lp), out_dtype),
        grid=(N,),
        in_specs=[
            # Grid-invariant operands: constant index_map, so Pallas does not re-DMA them
            # between grid steps.
            # TODO(synk): for large-K real layers, stage these once into scratch (or use
            # pipeline_mode=pl.Buffered(1)) to drop the default 2x VMEM of invariant inputs.
            pl.BlockSpec((KH * KW, OUTp, Cp), lambda n: (0, 0, 0)),
            pl.BlockSpec((OUTp, 1), lambda n: (0, 0)),
            pl.BlockSpec((OUTp, 1), lambda n: (0, 0)),
            # One flattened image per grid step (halo-free: shifts happen inside VMEM).
            pl.BlockSpec((None, Cp, Lin), lambda n: (n, 0, 0)),
        ],
        out_specs=pl.BlockSpec((None, OUTp, Lp), lambda n: (n, 0, 0)),
        compiler_params=pltpu.CompilerParams(
            dimension_semantics=("parallel",),          # batch across TCs (v7x megacore)
            vmem_limit_bytes=32 * 1024 * 1024,          # safe on v5e/v6e/v7x; blocks are small
        ),
    )(wk, scale, shift, xflat)

    # Final layout: drop padded channels, keep valid rows/cols.  Already NCHW-ordered,
    # so this is only a cheap slice (no transpose, no full-output relayout).
    y = out[:, :OUT, :n_rows * Wp].reshape(N, OUT, n_rows, Wp)
    y = y[:, :, ::s, 0:(OW - 1) * s + 1:s]
    return y


def _reference(x, weight, gamma, beta, running_mean, running_var, *,
               stride, padding, eps=1e-3):
    y = jax.lax.conv_general_dilated(
        x.astype(jnp.float32), weight.astype(jnp.float32),
        window_strides=(stride, stride),
        padding=[(padding, padding), (padding, padding)],
        dimension_numbers=("NCHW", "OIHW", "NCHW"))
    scale = gamma / jnp.sqrt(running_var + eps)
    shift = beta - running_mean * scale
    y = y * scale[None, :, None, None] + shift[None, :, None, None]
    return jnp.maximum(y, 0.0)


if __name__ == "__main__":
    key = jax.random.PRNGKey(0)
    k_x, k_w, k_g, k_b, k_m, k_v = jax.random.split(key, 6)

    # module config: BasicConv2d_inc_res_2(in_planes=4, out_planes=8,
    #                                      kernel_size=3, stride=1, padding=1)
    N, C, H, W = 2, 4, 16, 16
    OUT, KH, KW = 8, 3, 3
    stride, padding = 1, 1

    x = jax.random.normal(k_x, (N, C, H, W), dtype=jnp.float32)
    weight = jax.random.normal(k_w, (OUT, C, KH, KW), dtype=jnp.float32) * 0.1
    gamma = 1.0 + 0.1 * jax.random.normal(k_g, (OUT,), dtype=jnp.float32)
    beta = 0.1 * jax.random.normal(k_b, (OUT,), dtype=jnp.float32)
    running_mean = 0.05 * jax.random.normal(k_m, (OUT,), dtype=jnp.float32)
    running_var = 0.5 + jnp.abs(jax.random.normal(k_v, (OUT,), dtype=jnp.float32))

    # f32-operand path: tight check against the XLA conv reference.
    out_f32 = basic_conv2d_inc_res_2(
        x, weight, gamma, beta, running_mean, running_var,
        stride=stride, padding=padding, compute_dtype=jnp.float32)
    out_f32 = jax.block_until_ready(out_f32)
    ref = _reference(x, weight, gamma, beta, running_mean, running_var,
                     stride=stride, padding=padding)
    assert out_f32.shape == (N, OUT, H, W), out_f32.shape
    assert jnp.allclose(out_f32, ref, atol=2e-4, rtol=2e-4), \
        float(jnp.max(jnp.abs(out_f32 - ref)))

    # Default bf16-operand path: compare against a reference fed the same bf16-quantized
    # inputs (bf16 products are exact in f32, so only summation-order noise remains).
    out_bf16 = basic_conv2d_inc_res_2(
        x, weight, gamma, beta, running_mean, running_var,
        stride=stride, padding=padding)
    out_bf16 = jax.block_until_ready(out_bf16)
    ref_q = _reference(x.astype(jnp.bfloat16).astype(jnp.float32),
                       weight.astype(jnp.bfloat16).astype(jnp.float32),
                       gamma, beta, running_mean, running_var,
                       stride=stride, padding=padding)
    assert out_bf16.shape == (N, OUT, H, W), out_bf16.shape
    assert jnp.allclose(out_bf16, ref_q, atol=2e-3, rtol=2e-3), \
        float(jnp.max(jnp.abs(out_bf16 - ref_q)))

    print("KERNEL_OK")
</pallas_src>

<mosaic_0001>
module attributes {stable_mosaic.version = 11 : i64} {
  func.func @kernel(%arg0: i32, %arg1: memref<9x8x8xf32, #tpu.memory_space<vmem>>, %arg2: memref<8x1xf32, #tpu.memory_space<vmem>>, %arg3: memref<8x1xf32, #tpu.memory_space<vmem>>, %arg4: memref<1x8x512xf32, #tpu.memory_space<vmem>>, %arg5: memref<1x8x384xf32, #tpu.memory_space<vmem>>) attributes {dimension_semantics = [#tpu.dimension_semantics<parallel>], iteration_bounds = array<i64: 2>, scalar_prefetch = 0 : i64, scratch_operands = 0 : i64, tpu.core_type = #tpu.core_type<tc>, window_params = [{pipeline_mode = #tpu.pipeline_mode<synchronous>, transform_indices = @transform_0, window_bounds = array<i64: 9, 8, 8>}, {pipeline_mode = #tpu.pipeline_mode<synchronous>, transform_indices = @transform_1, window_bounds = array<i64: 8, 1>}, {pipeline_mode = #tpu.pipeline_mode<synchronous>, transform_indices = @transform_2, window_bounds = array<i64: 8, 1>}, {transform_indices = @transform_3, window_bounds = array<i64: 1, 8, 512>}, {transform_indices = @transform_4, window_bounds = array<i64: 1, 8, 384>}]} {
    %c0 = arith.constant 0 : index
    %c0_0 = arith.constant 0 : index
    %c0_1 = arith.constant 0 : index
    %0 = vector.load %arg4[%c0, %c0_0, %c0_1] : memref<1x8x512xf32, #tpu.memory_space<vmem>>, vector<1x8x384xf32>
    %1 = vector.shape_cast %0 : vector<1x8x384xf32> to vector<8x384xf32>
    %c0_2 = arith.constant 0 : index
    %c0_3 = arith.constant 0 : index
    %c0_4 = arith.constant 0 : index
    %2 = vector.load %arg1[%c0_2, %c0_3, %c0_4] : memref<9x8x8xf32, #tpu.memory_space<vmem>>, vector<1x8x8xf32>
    %3 = vector.shape_cast %2 : vector<1x8x8xf32> to vector<8x8xf32>
    %cst = arith.constant dense<0.000000e+00> : vector<8x384xf32>
    %4 = tpu.matmul %3, %1, %cst {dimension_numbers = #tpu.dot_dimension_numbers<[1], [0], [0], [1], [0, 0, 1, 1], [], []>} : vector<8x8xf32>, vector<8x384xf32>, vector<8x384xf32> -> vector<8x384xf32>
    %c0_5 = arith.constant 0 : index
    %c0_6 = arith.constant 0 : index
    %c1 = arith.constant 1 : index
    %5 = vector.load %arg4[%c0_5, %c0_6, %c1] : memref<1x8x512xf32, #tpu.memory_space<vmem>>, vector<1x8x384xf32>
    %6 = vector.shape_cast %5 : vector<1x8x384xf32> to vector<8x384xf32>
    %c1_7 = arith.constant 1 : index
    %c0_8 = arith.constant 0 : index
    %c0_9 = arith.constant 0 : index
    %7 = vector.load %arg1[%c1_7, %c0_8, %c0_9] : memref<9x8x8xf32, #tpu.memory_space<vmem>>, vector<1x8x8xf32>
    %8 = vector.shape_cast %7 : vector<1x8x8xf32> to vector<8x8xf32>
    %cst_10 = arith.constant dense<0.000000e+00> : vector<8x384xf32>
    %9 = tpu.matmul %8, %6, %cst_10 {dimension_numbers = #tpu.dot_dimension_numbers<[1], [0], [0], [1], [0, 0, 1, 1], [], []>} : vector<8x8xf32>, vector<8x384xf32>, vector<8x384xf32> -> vector<8x384xf32>
    %10 = arith.addf %4, %9 : vector<8x384xf32>
    %c0_11 = arith.constant 0 : index
    %c0_12 = arith.constant 0 : index
    %c2 = arith.constant 2 : index
    %11 = vector.load %arg4[%c0_11, %c0_12, %c2] : memref<1x8x512xf32, #tpu.memory_space<vmem>>, vector<1x8x384xf32>
    %12 = vector.shape_cast %11 : vector<1x8x384xf32> to vector<8x384xf32>
    %c2_13 = arith.constant 2 : index
    %c0_14 = arith.constant 0 : index
    %c0_15 = arith.constant 0 : index
    %13 = vector.load %arg1[%c2_13, %c0_14, %c0_15] : memref<9x8x8xf32, #tpu.memory_space<vmem>>, vector<1x8x8xf32>
    %14 = vector.shape_cast %13 : vector<1x8x8xf32> to vector<8x8xf32>
    %cst_16 = arith.constant dense<0.000000e+00> : vector<8x384xf32>
    %15 = tpu.matmul %14, %12, %cst_16 {dimension_numbers = #tpu.dot_dimension_numbers<[1], [0], [0], [1], [0, 0, 1, 1], [], []>} : vector<8x8xf32>, vector<8x384xf32>, vector<8x384xf32> -> vector<8x384xf32>
    %16 = arith.addf %10, %15 : vector<8x384xf32>
    %c0_17 = arith.constant 0 : index
    %c0_18 = arith.constant 0 : index
    %c18 = arith.constant 18 : index
    %17 = vector.load %arg4[%c0_17, %c0_18, %c18] : memref<1x8x512xf32, #tpu.memory_space<vmem>>, vector<1x8x384xf32>
    %18 = vector.shape_cast %17 : vector<1x8x384xf32> to vector<8x384xf32>
    %c3 = arith.constant 3 : index
    %c0_19 = arith.constant 0 : index
    %c0_20 = arith.constant 0 : index
    %19 = vector.load %arg1[%c3, %c0_19, %c0_20] : memref<9x8x8xf32, #tpu.memory_space<vmem>>, vector<1x8x8xf32>
    %20 = vector.shape_cast %19 : vector<1x8x8xf32> to vector<8x8xf32>
    %cst_21 = arith.constant dense<0.000000e+00> : vector<8x384xf32>
    %21 = tpu.matmul %20, %18, %cst_21 {dimension_numbers = #tpu.dot_dimension_numbers<[1], [0], [0], [1], [0, 0, 1, 1], [], []>} : vector<8x8xf32>, vector<8x384xf32>, vector<8x384xf32> -> vector<8x384xf32>
    %22 = arith.addf %16, %21 : vector<8x384xf32>
    %c0_22 = arith.constant 0 : index
    %c0_23 = arith.constant 0 : index
    %c19 = arith.constant 19 : index
    %23 = vector.load %arg4[%c0_22, %c0_23, %c19] : memref<1x8x512xf32, #tpu.memory_space<vmem>>, vector<1x8x384xf32>
    %24 = vector.shape_cast %23 : vector<1x8x384xf32> to vector<8x384xf32>
    %c4 = arith.constant 4 : index
    %c0_24 = arith.constant 0 : index
    %c0_25 = arith.constant 0 : index
    %25 = vector.load %arg1[%c4, %c0_24, %c0_25] : memref<9x8x8xf32, #tpu.memory_space<vmem>>, vector<1x8x8xf32>
    %26 = vector.shape_cast %25 : vector<1x8x8xf32> to vector<8x8xf32>
    %cst_26 = arith.constant dense<0.000000e+00> : vector<8x384xf32>
    %27 = tpu.matmul %26, %24, %cst_26 {dimension_numbers = #tpu.dot_dimension_numbers<[1], [0], [0], [1], [0, 0, 1, 1], [], []>} : vector<8x8xf32>, vector<8x384xf32>, vector<8x384xf32> -> vector<8x384xf32>
    %28 = arith.addf %22, %27 : vector<8x384xf32>
    %c0_27 = arith.constant 0 : index
    %c0_28 = arith.constant 0 : index
    %c20 = arith.constant 20 : index
    %29 = vector.load %arg4[%c0_27, %c0_28, %c20] : memref<1x8x512xf32, #tpu.memory_space<vmem>>, vector<1x8x384xf32>
    %30 = vector.shape_cast %29 : vector<1x8x384xf32> to vector<8x384xf32>
    %c5 = arith.constant 5 : index
    %c0_29 = arith.constant 0 : index
    %c0_30 = arith.constant 0 : index
    %31 = vector.load %arg1[%c5, %c0_29, %c0_30] : memref<9x8x8xf32, #tpu.memory_space<vmem>>, vector<1x8x8xf32>
    %32 = vector.shape_cast %31 : vector<1x8x8xf32> to vector<8x8xf32>
    %cst_31 = arith.constant dense<0.000000e+00> : vector<8x384xf32>
    %33 = tpu.matmul %32, %30, %cst_31 {dimension_numbers = #tpu.dot_dimension_numbers<[1], [0], [0], [1], [0, 0, 1, 1], [], []>} : vector<8x8xf32>, vector<8x384xf32>, vector<8x384xf32> -> vector<8x384xf32>
    %34 = arith.addf %28, %33 : vector<8x384xf32>
    %c0_32 = arith.constant 0 : index
    %c0_33 = arith.constant 0 : index
    %c36 = arith.constant 36 : index
    %35 = vector.load %arg4[%c0_32, %c0_33, %c36] : memref<1x8x512xf32, #tpu.memory_space<vmem>>, vector<1x8x384xf32>
    %36 = vector.shape_cast %35 : vector<1x8x384xf32> to vector<8x384xf32>
    %c6 = arith.constant 6 : index
    %c0_34 = arith.constant 0 : index
    %c0_35 = arith.constant 0 : index
    %37 = vector.load %arg1[%c6, %c0_34, %c0_35] : memref<9x8x8xf32, #tpu.memory_space<vmem>>, vector<1x8x8xf32>
    %38 = vector.shape_cast %37 : vector<1x8x8xf32> to vector<8x8xf32>
    %cst_36 = arith.constant dense<0.000000e+00> : vector<8x384xf32>
    %39 = tpu.matmul %38, %36, %cst_36 {dimension_numbers = #tpu.dot_dimension_numbers<[1], [0], [0], [1], [0, 0, 1, 1], [], []>} : vector<8x8xf32>, vector<8x384xf32>, vector<8x384xf32> -> vector<8x384xf32>
    %40 = arith.addf %34, %39 : vector<8x384xf32>
    %c0_37 = arith.constant 0 : index
    %c0_38 = arith.constant 0 : index
    %c37 = arith.constant 37 : index
    %41 = vector.load %arg4[%c0_37, %c0_38, %c37] : memref<1x8x512xf32, #tpu.memory_space<vmem>>, vector<1x8x384xf32>
    %42 = vector.shape_cast %41 : vector<1x8x384xf32> to vector<8x384xf32>
    %c7 = arith.constant 7 : index
    %c0_39 = arith.constant 0 : index
    %c0_40 = arith.constant 0 : index
    %43 = vector.load %arg1[%c7, %c0_39, %c0_40] : memref<9x8x8xf32, #tpu.memory_space<vmem>>, vector<1x8x8xf32>
    %44 = vector.shape_cast %43 : vector<1x8x8xf32> to vector<8x8xf32>
    %cst_41 = arith.constant dense<0.000000e+00> : vector<8x384xf32>
    %45 = tpu.matmul %44, %42, %cst_41 {dimension_numbers = #tpu.dot_dimension_numbers<[1], [0], [0], [1], [0, 0, 1, 1], [], []>} : vector<8x8xf32>, vector<8x384xf32>, vector<8x384xf32> -> vector<8x384xf32>
    %46 = arith.addf %40, %45 : vector<8x384xf32>
    %c0_42 = arith.constant 0 : index
    %c0_43 = arith.constant 0 : index
    %c38 = arith.constant 38 : index
    %47 = vector.load %arg4[%c0_42, %c0_43, %c38] : memref<1x8x512xf32, #tpu.memory_space<vmem>>, vector<1x8x384xf32>
    %48 = vector.shape_cast %47 : vector<1x8x384xf32> to vector<8x384xf32>
    %c8 = arith.constant 8 : index
    %c0_44 = arith.constant 0 : index
    %c0_45 = arith.constant 0 : index
    %49 = vector.load %arg1[%c8, %c0_44, %c0_45] : memref<9x8x8xf32, #tpu.memory_space<vmem>>, vector<1x8x8xf32>
    %50 = vector.shape_cast %49 : vector<1x8x8xf32> to vector<8x8xf32>
    %cst_46 = arith.constant dense<0.000000e+00> : vector<8x384xf32>
    %51 = tpu.matmul %50, %48, %cst_46 {dimension_numbers = #tpu.dot_dimension_numbers<[1], [0], [0], [1], [0, 0, 1, 1], [], []>} : vector<8x8xf32>, vector<8x384xf32>, vector<8x384xf32> -> vector<8x384xf32>
    %52 = arith.addf %46, %51 : vector<8x384xf32>
    %c0_47 = arith.constant 0 : index
    %c0_48 = arith.constant 0 : index
    %53 = vector.load %arg2[%c0_47, %c0_48] : memref<8x1xf32, #tpu.memory_space<vmem>>, vector<8x1xf32>
    %54 = vector.broadcast %53 : vector<8x1xf32> to vector<8x384xf32>
    %55 = arith.mulf %52, %54 : vector<8x384xf32>
    %c0_49 = arith.constant 0 : index
    %c0_50 = arith.constant 0 : index
    %56 = vector.load %arg3[%c0_49, %c0_50] : memref<8x1xf32, #tpu.memory_space<vmem>>, vector<8x1xf32>
    %57 = vector.broadcast %56 : vector<8x1xf32> to vector<8x384xf32>
    %58 = arith.addf %55, %57 : vector<8x384xf32>
    %cst_51 = arith.constant 0.000000e+00 : f32
    %59 = vector.broadcast %cst_51 : f32 to vector<8x384xf32>
    %60 = arith.maximumf %58, %59 : vector<8x384xf32>
    %c0_52 = arith.constant 0 : index
    %c0_53 = arith.constant 0 : index
    %c0_54 = arith.constant 0 : index
    %61 = vector.load %arg5[%c0_52, %c0_53, %c0_54] : memref<1x8x384xf32, #tpu.memory_space<vmem>>, vector<1x8x384xf32>
    %62 = vector.shape_cast %61 : vector<1x8x384xf32> to vector<8x384xf32>
    %63 = vector.shape_cast %60 : vector<8x384xf32> to vector<1x8x384xf32>
    tpu.vector_store %arg5[%c0_52, %c0_53, %c0_54], %63 {strides = array<i32>} : memref<1x8x384xf32, #tpu.memory_space<vmem>>, vector<1x8x384xf32>,
    return
  }
  func.func @transform_0(%arg0: i32) -> (i32, i32, i32) {
    %c0_i32 = arith.constant 0 : i32
    %c0_i32_0 = arith.constant 0 : i32
    %c0_i32_1 = arith.constant 0 : i32
    %c0_i32_2 = arith.constant 0 : i32
    return %c0_i32, %c0_i32_0, %c0_i32_1 : i32, i32, i32
  }
  func.func @transform_1(%arg0: i32) -> (i32, i32) {
    %c0_i32 = arith.constant 0 : i32
    %c0_i32_0 = arith.constant 0 : i32
    %c0_i32_1 = arith.constant 0 : i32
    return %c0_i32, %c0_i32_0 : i32, i32
  }
  func.func @transform_2(%arg0: i32) -> (i32, i32) {
    %c0_i32 = arith.constant 0 : i32
    %c0_i32_0 = arith.constant 0 : i32
    %c0_i32_1 = arith.constant 0 : i32
    return %c0_i32, %c0_i32_0 : i32, i32
  }
  func.func @transform_3(%arg0: i32) -> (i32, i32, i32) {
    %c0_i32 = arith.constant 0 : i32
    %c0_i32_0 = arith.constant 0 : i32
    %c0_i32_1 = arith.constant 0 : i32
    return %arg0, %c0_i32, %c0_i32_0 : i32, i32, i32
  }
  func.func @transform_4(%arg0: i32) -> (i32, i32, i32) {
    %c0_i32 = arith.constant 0 : i32
    %c0_i32_0 = arith.constant 0 : i32
    %c0_i32_1 = arith.constant 0 : i32
    return %arg0, %c0_i32, %c0_i32_0 : i32, i32, i32
  }
}

</mosaic_0001>

<bundles_post_ra>
// kernel: tpu_custom_call.1
= control target key start
LH: loop header
LB: loop body
LE: loop exit
PB: predicated region body
PF: predicated region fallthrough
CT: control target
= control target key end

     0   :  { %9 = vsyncpa [#allocation3], 0  ;;  %s2287_s0 = inlined_call_operand.vmem [shape: f32[9,8,8], index: 0, kind: input, shape index: {}]   ;;  %s2288_s1 = inlined_call_operand.vmem [shape: f32[8,1], index: 1, kind: input, shape index: {}]   ;;  %s2289_s2 = inlined_call_operand.vmem [shape: f32[8,1], index: 2, kind: input, shape index: {}]   ;;  %s2290_s3 = inlined_call_operand.vmem [shape: f32[2,8,512], index: 3, kind: input, shape index: {}]   ;;  %s2291_s4 = inlined_call_operand.hbm [shape: f32[2,8,384], index: 4, kind: output, shape index: {}]  }
   0x1   :  { %11 = vsyncpa [#allocation3 + $0x1], 0  ;;  %s2046_s15 = smov 0   ;;  %s2048_s16 = smov 0  }
   0x2   :  { %s2050_s17 = smov 0   ;;  %s2052_s18 = smov 0  }
   0x3 LB: > { %s2067_s19 = sadd.s32 4294967295, %s2007_s18   ;;  %s1760_s20 = sadd.s32 4294967294, %s2007_s18   ;;  %s2007_s18 = sphi %s2052_s18, %s2297_s18   ;;  %s2003_s17 = sphi %s2050_s17, %s2296_s17   ;;  %s1999_s16 = sphi %s2048_s16, %s2295_s16   ;;  %s1995_s15 = sphi %s2046_s15, %s2294_s15  }
   0x4   : > { %s2071_s21 = sadd.s32 1, %s2007_s18   ;;  %s113_s22 = sadd.s32 1, %s2003_s17 }
   0x5   : > { %s110_s23 = ssub.s32 %s2007_s18, %s2071_s21  ;;  %p123_p0 = scmp.ne.s32.totalorder %s2003_s17, %s1999_s16 }
   0x6   : > { %p111_p1 = scmp.eq.s32.totalorder %s110_s23, 0  ;;  %p124_p2 = scmp.eq.s32.totalorder %s2067_s19, 1 }
   0x7   : > { %p129_p3 = scmp.ne.s32.totalorder %s1999_s16, %s1995_s15  ;;  %p130_p4 = scmp.eq.s32.totalorder %s1760_s20, 1 }
   0x8   : > { %s2082_s24 = scalar_select %p111_p1, %s2003_s17, %s113_s22  }
   0x9   : > { %p2084_p5 = por %p124_p2, %p123_p0  ;;  %p2088_p6 = por %p130_p4, %p129_p3 }
   0xa   : > { %p1763_p7 = scmp.ge.s32.totalorder %s2007_s18, 1  ;;  %p165_p8 = scmp.lt.s32.totalorder %s2007_s18, 3 }
   0xc   : > { %p166_p9 = pnand %p1763_p7, %p165_p8 }
   0xd   : > { %p191_p10 = scmp.lt.s32.totalorder (!%p166_p9), %s2067_s19, 1  ;;  %v2009_v0 = vmov (!%p166_p9), 0.0   ;;  %vm2010_vm0 = vmmov (!%p166_p9), 0   ;;  %s2011_s6 = smov (!%p166_p9), 127   ;;  %v2019_v5 = vmov (!%p166_p9), 0   ;;  %v1662_v6 = vld [vmem:[%s2288_s1] sm:$0xff] (!%p166_p9) }
   0xe   : > { %169 = sbr.rel (%p166_p9) target bundleno = 445 (0x1bd), region = 36  ;;  %1814 = vmatprep.subr.mxu1 (!%p166_p9), %v2009_v0  ;;  %1816 = vmatprep.mubr.msk.f32.mxu1 (!%p166_p9), %vm2010_vm0, %v2009_v0  ;;  %s2012_s7 = smov (!%p166_p9), 126   ;;  %v1671_v7 = vld [vmem:[%s2289_s2] sm:$0xff] (!%p166_p9)  ;;  %vm218_vm1 = vcmask (!%p166_p9), 1039360   ;;  %v1766_v12 = vld [vmem:[%s2287_s0 + $0x8] sm:$0xff] (!%p166_p9)  ;;  %vm225_vm2 = vcmask (!%p166_p9), 64512  }
   0xf   : > { %293 = vmatprep.mubr.f32.mxu0 (!%p166_p9), %v2009_v0  ;;  %s2013_s8 = smov (!%p166_p9), 110   ;;  %s2014_s9 = smov (!%p166_p9), 109   ;;  %1943 = vset.pattern.permute.xlu0 (!%p166_p9), %v2019_v5  ;;  %vm524_vm3 = vcmask (!%p166_p9), 1031168   ;;  %v199_v21 = vld [vmem:[%s2287_s0] sm:$0xff] (!%p166_p9)  ;;  %vm688_vm4 = vcmask (!%p166_p9), 900096   ;;  %v1771_v29 = vld [vmem:[%s2287_s0 + $0x10] sm:$0xff] (!%p166_p9) }
  0x10   : > { %s2015_s10 = smov (!%p166_p9), 108   ;;  %s2016_s11 = smov (!%p166_p9), 92   ;;  %1944 = vset.pattern.permute.xlu1 (!%p166_p9), %v2019_v5  ;;  %vm852_vm5 = vcmask (!%p166_p9), 891904   ;;  %v1774_v37 = vld [vmem:[%s2287_s0 + $0x18] sm:$0xff] (!%p166_p9)  ;;  %vm1016_vm6 = vcmask (!%p166_p9), 883712   ;;  %v1777_v45 = vld [vmem:[%s2287_s0 + $0x20] sm:$0xff] (!%p166_p9) }
  0x11   : > { %s2017_s12 = smov (!%p166_p9), 91   ;;  %s2018_s13 = smov (!%p166_p9), 90   ;;  %vm1180_vm7 = vcmask (!%p166_p9), 752640   ;;  %v1780_v53 = vld [vmem:[%s2287_s0 + $0x28] sm:$0xff] (!%p166_p9)  ;;  %vm1344_vm8 = vcmask (!%p166_p9), 744448   ;;  %v1783_v61 = vld [vmem:[%s2287_s0 + $0x30] sm:$0xff] (!%p166_p9) }
  0x12   : > { %vm1508_vm9 = vcmask (!%p166_p9), 736256   ;;  %s1892_s30 = smul.u32 (!%p166_p9), 384, %s2067_s19 }
  0x15   : > { %s192_s27 = scalar_select %p191_p10, %s2067_s19, 1 }
  0x17   : > { %s1795_s28 = sshll.u32 %s192_s27, 5 }
  0x18   : > { %s195_s5 = scalar_lea.vmem %s2290_s3, %s1795_s28  ;;  %s188_s28 = sand.u32 1, %s1999_s16  }
  0x19   : > { %v2103_v1 = vld [vmem:[%s195_s5 + $0x8] sm:$0xff]  ;;  %v2105_v2 = vld [vmem:[%s195_s5] sm:$0xff]  ;;  %v2109_v3 = vld [vmem:[%s195_s5 + $0x10] sm:$0xff]  ;;  %s1891_s29 = smul.u32 24, %s188_s28  ;;  %s1687_s19 = scalar_lea.sflag [#allocation3], %s188_s28 }
  0x1a   : > { %212 = vrot.lane.b32.xlu0 %v2103_v1, %s2011_s6  ;;  %210 = vrot.lane.b32.xlu1 %v2105_v2, %s2011_s6  ;;  %v203_v4 = vld [vmem:[%s195_s5 + $0x18] sm:$0xff] }
  0x1b   : > { %s190_s5 = scalar_lea.vmem [#allocation2], %s1891_s29 }
  0x1e   : > { %214 = vrot.lane.b32.xlu0 %v2109_v3, %s2011_s6  ;;  %216 = vrot.lane.b32.xlu1 %v203_v4, %s2011_s6  ;;  %s1701_s6 = sshll.u32 %s190_s5, 4  ;;  %s2247_s6 = int_to_ptr.vmem [resolvable:$true] %s1701_s6 }
  0x22   : > { %518 = vrot.lane.b32.xlu0 %v2103_v1, %s2012_s7  ;;  %520 = vrot.lane.b32.xlu1 %v2109_v3, %s2012_s7 }
  0x26   : > { %516 = vrot.lane.b32.xlu0 %v2105_v2, %s2012_s7  ;;  %522 = vrot.lane.b32.xlu1 %v203_v4, %s2012_s7 }
  0x2a   : > { %682 = vrot.lane.b32.xlu0 %v2103_v1, %s2013_s8  ;;  %684 = vrot.lane.b32.xlu1 %v2109_v3, %s2013_s8 }
  0x2e   : > { %680 = vrot.lane.b32.xlu0 %v2105_v2, %s2013_s8  ;;  %686 = vrot.lane.b32.xlu1 %v203_v4, %s2013_s8 }
  0x32   : > { %846 = vrot.lane.b32.xlu0 %v2103_v1, %s2014_s9  ;;  %848 = vrot.lane.b32.xlu1 %v2109_v3, %s2014_s9 }
  0x36   : > { %844 = vrot.lane.b32.xlu0 %v2105_v2, %s2014_s9  ;;  %850 = vrot.lane.b32.xlu1 %v203_v4, %s2014_s9  ;;  %s2245_s9 = scalar_lea.hbm %s2291_s4, %s1892_s30 }
  0x3a   : > { %1010 = vrot.lane.b32.xlu0 %v2103_v1, %s2015_s10  ;;  %1012 = vrot.lane.b32.xlu1 %v2109_v3, %s2015_s10 }
  0x3e   : > { %1008 = vrot.lane.b32.xlu0 %v2105_v2, %s2015_s10  ;;  %1014 = vrot.lane.b32.xlu1 %v203_v4, %s2015_s10  ;;  %s1945_s10 = scalar_lea.vmem %s2247_s6, 384 }
  0x3f   : > { %p1946_p11 = scmp.ne.s32.totalorder %s2247_s6, %s1945_s10 }
  0x41   : > { %p1947_p12 = pnand %p1946_p11, %p2084_p5 }
  0x42   : > { %1174 = vrot.lane.b32.xlu0 %v2103_v1, %s2016_s11  ;;  %1176 = vrot.lane.b32.xlu1 %v2109_v3, %s2016_s11 }
  0x43   : > { %p1948_p13 = pneg %p1947_p12 }
  0x46   : > { %1172 = vrot.lane.b32.xlu0 %v2105_v2, %s2016_s11  ;;  %1178 = vrot.lane.b32.xlu1 %v203_v4, %s2016_s11  ;;  %s2020_s11 = smov [#allocation2]  }
  0x4a   : > { %1338 = vrot.lane.b32.xlu0 %v2103_v1, %s2017_s12  ;;  %1340 = vrot.lane.b32.xlu1 %v2109_v3, %s2017_s12 }
  0x4e   : > { %1336 = vrot.lane.b32.xlu0 %v2105_v2, %s2017_s12  ;;  %1342 = vrot.lane.b32.xlu1 %v203_v4, %s2017_s12  ;;  %s1949_s12 = sshll.u32 %s2020_s11, 4  ;;  %s1950_s12 = int_to_ptr.vmem [resolvable:$false] %s1949_s12 }
  0x4f   : > { %p1952_p0 = scmp.lt.s32.totalorder %s2247_s6, %s1950_s12 }
  0x52   : > { %1502 = vrot.lane.b32.xlu0 %v2103_v1, %s2018_s13  ;;  %1504 = vrot.lane.b32.xlu1 %v2109_v3, %s2018_s13 }
  0x56   : > { %1500 = vrot.lane.b32.xlu0 %v2105_v2, %s2018_s13  ;;  %1506 = vrot.lane.b32.xlu1 %v203_v4, %s2018_s13  ;;  %s1951_s13 = scalar_lea.vmem %s1950_s12, 768 }
  0x57   : > { %p1953_p1 = scmp.lt.s32.totalorder %s1951_s13, %s1945_s10 }
  0x59   : > { %p1954_p2 = por %p1953_p1, %p1952_p0 }
  0x5a   : > { %1665 = vperm.xlu0 %1943, %v1662_v6   ;;  %1674 = vperm.xlu1 %1944, %v1671_v7   ;;  %v1786_v6 = vld [vmem:[%s2287_s0 + $0x38] sm:$0xff] }
  0x5b   : > { %p1955_p3 = pnand %p1954_p2, %p1948_p13 }
  0x8c   : > { %v213_v8 = vpop.permute.xlu0 %212  ;;  %v211_v9 = vpop.permute.xlu1 %210 }
  0x8d   : > { %v219_v15 = vsel %vm218_vm1, %v211_v9, %v213_v8  ;;  %v1789_v9 = vld [vmem:[%s2287_s0 + $0x40] sm:$0xff] }
  0x90   : > { %v215_v10 = vpop.permute.xlu0 %214  ;;  %v217_v11 = vpop.permute.xlu1 %216 }
  0x91   : > { %v220_v13 = vsel %vm218_vm1, %v213_v8, %v215_v10  ;;  %v221_v14 = vsel %vm218_vm1, %v215_v10, %v217_v11 }
  0x92   : > { %229 = vmatprep.subr.mxu0 %v220_v13  ;;  %1815 = vmatpush3.msra.mxu1 %v221_v14 }
  0x93   : > { %230 = vmatpush1.msra.mxu0 %v219_v15  ;;  %1817 = vmatmul.mubr.msk.f32.vlgmr.msra.gmra.mrb[0].mxu1 %vm225_vm2, %v1766_v12 }
  0x94   : > { %v519_v16 = vpop.permute.xlu0 %518  ;;  %1767 = vmatmul.mubr.msk.f32.vlgmr.msra.gmra.mrb[0].mxu0 %vm225_vm2, %v1766_v12  ;;  %v521_v17 = vpop.permute.xlu1 %520  ;;  %373 = vmatprep.subr.mxu0 %v2103_v1 }
  0x95   : > { %374 = vmatpush1.msra.mxu0 %v2105_v2  ;;  %1819 = vmatprep.subr.mxu1 %v2009_v0  ;;  %v526_v18 = vsel %vm524_vm3, %v519_v16, %v521_v17 }
  0x96   : > { %1820 = vmatpush3.msra.mxu1 %v2109_v3  ;;  %534 = vmatprep.subr.mxu0 %v526_v18 }
  0x97   : > { %1821 = vmatprep.mubr.msk.f32.mxu1 %vm2010_vm0, %v2009_v0  ;;  %1824 = vmatprep.subr.mxu1 %v2009_v0 }
  0x98   : > { %v517_v19 = vpop.permute.xlu0 %516  ;;  %v523_v20 = vpop.permute.xlu1 %522  ;;  %437 = vmatprep.mubr.f32.mxu0 %v2009_v0 }
  0x99   : > { %v527_v22 = vsel %vm524_vm3, %v521_v17, %v523_v20  ;;  %v525_v23 = vsel %vm524_vm3, %v517_v19, %v519_v16 }
  0x9b   : > { %1822 = vmatmul.mubr.msk.f32.vlgmr.msra.gmra.mrb[0].mxu1 %vm225_vm2, %v199_v21 }
  0x9c   : > { %1825 = vmatpush3.msra.mxu1 %v527_v22  ;;  %v683_v24 = vpop.permute.xlu0 %682  ;;  %v685_v25 = vpop.permute.xlu1 %684  ;;  %1769 = vmatmul.mubr.msk.f32.vlgmr.msra.gmra.mrb[0].mxu0 %vm225_vm2, %v199_v21 }
  0x9d   : > { %535 = vmatpush1.msra.mxu0 %v525_v23  ;;  %v690_v26 = vsel %vm688_vm4, %v683_v24, %v685_v25  ;;  %1826 = vmatprep.mubr.msk.f32.mxu1 %vm2010_vm0, %v2009_v0 }
  0x9e   : > { %698 = vmatprep.subr.mxu0 %v690_v26  ;;  %1829 = vmatprep.subr.mxu1 %v2009_v0 }
  0x9f   : > { %598 = vmatprep.mubr.f32.mxu0 %v2009_v0 }
  0xa0   : > { %v681_v27 = vpop.permute.xlu0 %680  ;;  %v687_v28 = vpop.permute.xlu1 %686 }
  0xa1   : > { %v691_v30 = vsel %vm688_vm4, %v685_v25, %v687_v28  ;;  %v689_v31 = vsel %vm688_vm4, %v681_v27, %v683_v24 }
  0xa3   : > { %1827 = vmatmul.mubr.msk.f32.vlgmr.msra.gmra.mrb[0].mxu1 %vm225_vm2, %v1771_v29 }
  0xa4   : > { %1830 = vmatpush3.msra.mxu1 %v691_v30  ;;  %v847_v32 = vpop.permute.xlu0 %846  ;;  %v849_v33 = vpop.permute.xlu1 %848  ;;  %1772 = vmatmul.mubr.msk.f32.vlgmr.msra.gmra.mrb[0].mxu0 %vm225_vm2, %v1771_v29 }
  0xa5   : > { %699 = vmatpush1.msra.mxu0 %v689_v31  ;;  %v854_v34 = vsel %vm852_vm5, %v847_v32, %v849_v33  ;;  %1831 = vmatprep.mubr.msk.f32.mxu1 %vm2010_vm0, %v2009_v0 }
  0xa6   : > { %862 = vmatprep.subr.mxu0 %v854_v34  ;;  %1834 = vmatprep.subr.mxu1 %v2009_v0 }
  0xa7   : > { %762 = vmatprep.mubr.f32.mxu0 %v2009_v0 }
  0xa8   : > { %v845_v35 = vpop.permute.xlu0 %844  ;;  %v851_v36 = vpop.permute.xlu1 %850 }
  0xa9   : > { %v855_v38 = vsel %vm852_vm5, %v849_v33, %v851_v36  ;;  %v853_v39 = vsel %vm852_vm5, %v845_v35, %v847_v32 }
  0xab   : > { %1832 = vmatmul.mubr.msk.f32.vlgmr.msra.gmra.mrb[0].mxu1 %vm225_vm2, %v1774_v37 }
  0xac   : > { %1835 = vmatpush3.msra.mxu1 %v855_v38  ;;  %v1011_v40 = vpop.permute.xlu0 %1010  ;;  %v1013_v41 = vpop.permute.xlu1 %1012  ;;  %1775 = vmatmul.mubr.msk.f32.vlgmr.msra.gmra.mrb[0].mxu0 %vm225_vm2, %v1774_v37 }
  0xad   : > { %863 = vmatpush1.msra.mxu0 %v853_v39  ;;  %v1018_v42 = vsel %vm1016_vm6, %v1011_v40, %v1013_v41  ;;  %1836 = vmatprep.mubr.msk.f32.mxu1 %vm2010_vm0, %v2009_v0 }
  0xae   : > { %1026 = vmatprep.subr.mxu0 %v1018_v42  ;;  %1839 = vmatprep.subr.mxu1 %v2009_v0 }
  0xaf   : > { %926 = vmatprep.mubr.f32.mxu0 %v2009_v0 }
  0xb0   : > { %v1009_v43 = vpop.permute.xlu0 %1008  ;;  %v1015_v44 = vpop.permute.xlu1 %1014 }
  0xb1   : > { %v1019_v46 = vsel %vm1016_vm6, %v1013_v41, %v1015_v44  ;;  %v1017_v47 = vsel %vm1016_vm6, %v1009_v43, %v1011_v40 }
  0xb3   : > { %1837 = vmatmul.mubr.msk.f32.vlgmr.msra.gmra.mrb[0].mxu1 %vm225_vm2, %v1777_v45 }
  0xb4   : > { %1840 = vmatpush3.msra.mxu1 %v1019_v46  ;;  %v1175_v48 = vpop.permute.xlu0 %1174  ;;  %v1177_v49 = vpop.permute.xlu1 %1176  ;;  %1778 = vmatmul.mubr.msk.f32.vlgmr.msra.gmra.mrb[0].mxu0 %vm225_vm2, %v1777_v45 }
  0xb5   : > { %1027 = vmatpush1.msra.mxu0 %v1017_v47  ;;  %v1182_v50 = vsel %vm1180_vm7, %v1175_v48, %v1177_v49  ;;  %1841 = vmatprep.mubr.msk.f32.mxu1 %vm2010_vm0, %v2009_v0 }
  0xb6   : > { %1190 = vmatprep.subr.mxu0 %v1182_v50  ;;  %1844 = vmatprep.subr.mxu1 %v2009_v0 }
  0xb7   : > { %1090 = vmatprep.mubr.f32.mxu0 %v2009_v0 }
  0xb8   : > { %v1173_v51 = vpop.permute.xlu0 %1172  ;;  %v1179_v52 = vpop.permute.xlu1 %1178 }
  0xb9   : > { %v1183_v54 = vsel %vm1180_vm7, %v1177_v49, %v1179_v52  ;;  %v1181_v55 = vsel %vm1180_vm7, %v1173_v51, %v1175_v48 }
  0xbb   : > { %1842 = vmatmul.mubr.msk.f32.vlgmr.msra.gmra.mrb[0].mxu1 %vm225_vm2, %v1780_v53 }
  0xbc   : > { %1845 = vmatpush3.msra.mxu1 %v1183_v54  ;;  %v1339_v56 = vpop.permute.xlu0 %1338  ;;  %v1341_v57 = vpop.permute.xlu1 %1340  ;;  %1781 = vmatmul.mubr.msk.f32.vlgmr.msra.gmra.mrb[0].mxu0 %vm225_vm2, %v1780_v53 }
  0xbd   : > { %1191 = vmatpush1.msra.mxu0 %v1181_v55  ;;  %v1346_v58 = vsel %vm1344_vm8, %v1339_v56, %v1341_v57  ;;  %1846 = vmatprep.mubr.msk.f32.mxu1 %vm2010_vm0, %v2009_v0 }
  0xbe   : > { %1354 = vmatprep.subr.mxu0 %v1346_v58  ;;  %1849 = vmatprep.subr.mxu1 %v2009_v0 }
  0xbf   : > { %1254 = vmatprep.mubr.f32.mxu0 %v2009_v0 }
  0xc0   : > { %v1337_v59 = vpop.permute.xlu0 %1336  ;;  %v1343_v60 = vpop.permute.xlu1 %1342 }
  0xc1   : > { %v1347_v62 = vsel %vm1344_vm8, %v1341_v57, %v1343_v60  ;;  %v1345_v63 = vsel %vm1344_vm8, %v1337_v59, %v1339_v56 }
  0xc3   : > { %1847 = vmatmul.mubr.msk.f32.vlgmr.msra.gmra.mrb[0].mxu1 %vm225_vm2, %v1783_v61 }
  0xc4   : > { %1850 = vmatpush3.msra.mxu1 %v1347_v62  ;;  %v1503_v1 = vpop.permute.xlu0 %1502  ;;  %v1505_v2 = vpop.permute.xlu1 %1504  ;;  %1784 = vmatmul.mubr.msk.f32.vlgmr.msra.gmra.mrb[0].mxu0 %vm225_vm2, %v1783_v61 }
  0xc5   : > { %1355 = vmatpush1.msra.mxu0 %v1345_v63  ;;  %v1510_v3 = vsel %vm1508_vm9, %v1503_v1, %v1505_v2  ;;  %1851 = vmatprep.mubr.msk.f32.mxu1 %vm2010_vm0, %v2009_v0 }
  0xc6   : > { %1518 = vmatprep.subr.mxu0 %v1510_v3  ;;  %1854 = vmatprep.subr.mxu1 %v2009_v0 }
  0xc7   : > { %1418 = vmatprep.mubr.f32.mxu0 %v2009_v0 }
  0xc8   : > { %v1501_v4 = vpop.permute.xlu0 %1500  ;;  %v1507_v5 = vpop.permute.xlu1 %1506 }
  0xc9   : > { %v1511_v7 = vsel %vm1508_vm9, %v1505_v2, %v1507_v5  ;;  %v1509_v8 = vsel %vm1508_vm9, %v1501_v4, %v1503_v1 }
  0xcb   : > { %1852 = vmatmul.mubr.msk.f32.vlgmr.msra.gmra.mrb[0].mxu1 %vm225_vm2, %v1786_v6 }
  0xcc   : > { %1855 = vmatpush3.msra.mxu1 %v1511_v7  ;;  %1787 = vmatmul.mubr.msk.f32.vlgmr.msra.gmra.mrb[0].mxu0 %vm225_vm2, %v1786_v6 }
  0xcd   : > { %1519 = vmatpush1.msra.mxu0 %v1509_v8  ;;  %1856 = vmatprep.mubr.msk.f32.mxu1 %vm2010_vm0, %v2009_v0 }
  0xce   : > { %1582 = vmatprep.mubr.f32.mxu0 %v2009_v0 }
  0xd3   : > { %1857 = vmatmul.mubr.msk.f32.vlgmr.msra.gmra.mrb[0].mxu1 %vm225_vm2, %v1789_v9 }
  0xd4   : > { %1790 = vmatmul.mubr.msk.f32.vlgmr.msra.gmra.mrb[0].mxu0 %vm225_vm2, %v1789_v9 }
  0xd9   : > { %v1666_v10 = vpop.permute.xlu0 %1665  ;;  %v1675_v12 = vpop.permute.xlu1 %1674 }
 0x1a6   : > { %v1655_v11 = vpop.f32.mrb[0].mxu1 }
 0x1a7   : > { %v1670_v13 = vmul.f32 %v1666_v10, %v1655_v11  ;;  %v1584_v14 = vpop.f32.mrb[0].mxu0  ;;  %v1858_v15 = vpop.f32.mrb[1].mxu1 }
 0x1a8   : > { %v1668_v16 = vmul.f32 %v1666_v10, %v1584_v14  ;;  %v1586_v17 = vpop.f32.mrb[1].mxu0 }
 0x1a9   : > { %v1679_v0 = vadd.f32 %v1675_v12, %v1670_v13  ;;  %v1669_v18 = vmul.f32 %v1666_v10, %v1586_v17 }
 0x1aa   : > { %v1677_v19 = vadd.f32 %v1675_v12, %v1668_v16 }
 0x1ab   : > { %v1682_v20 = vmax.f32 %v1679_v0, 0.0  ;;  %v1678_v21 = vadd.f32 %v1675_v12, %v1669_v18 }
 0x1ac   : > { %v1680_v22 = vmax.f32 %v1677_v19, 0.0 }
 0x1ad   : > { %1685 = vst [vmem:[%s190_s5 + $0x10] sm:$0xff] %v1682_v20  ;;  %v1681_v23 = vmax.f32 %v1678_v21, 0.0 }
 0x1ae   : > { %1683 = vst [vmem:[%s190_s5] sm:$0xff] %v1680_v22 }
 0x1af   : > { %1684 = vst [vmem:[%s190_s5 + $0x8] sm:$0xff] %v1681_v23 }
 0x1b0   : > { %1958 = shalt.err (!%p1955_p3)
}
 0x1b1   : > { %s1959_s14 = scalar_lea.hbm %s2245_s9, 384  ;;  %s1963_s23 = scalar_lea.hbm %s2291_s4, 768 }
 0x1b2   : > { %p1960_p4 = scmp.ne.s32.totalorder %s2245_s9, %s1959_s14  ;;  %p1964_p9 = scmp.lt.u32.totalorder %s2245_s9, %s2291_s4 }
 0x1b3   : > { %p1965_p10 = scmp.lt.u32.totalorder %s1963_s23, %s1959_s14  ;;  %p1967_p12 = scmp.lt.u32.totalorder %s1959_s14, %s2245_s9 }
 0x1b4   : > { %p1961_p7 = pnand %p1960_p4, %p2084_p5 }
 0x1b5   : > { %p1966_p11 = por %p1965_p10, %p1964_p9 }
 0x1b6   : > { %p1962_p8 = pneg %p1961_p7 }
 0x1b7   : > { %p1968_p13 = por %p1967_p12, %p1966_p11 }
 0x1b9   : > { %p1969_p0 = pnand %p1968_p13, %p1962_p8 }
 0x1bb   : > { %1972 = shalt.err (!%p1969_p0)
}
 0x1bc   : > { %1893 = dma.vmem_to_hbm [thread:$0]  (%p2084_p5), %s2247_s6, 384, %s2245_s9, %s1687_s19  }
 0x1bd PF: > { %p1899_p1 = scmp.ge.s32.totalorder %s2007_s18, 2  ;;  %s1713_s29 = sand.u32 1, %s1995_s15  }
 0x1be   : > { %s1714_s30 = scalar_lea.sflag [#allocation3], %s1713_s29 }
 0x1bf   : > { %p1896_p2 = pnand %p1899_p1, %p2088_p6 }
 0x1c1   : > { %1990 = dma.done.wait (!%p1896_p2), %s1714_s30, 384  }
 0x1c2   : > { %1992 = vsyncadd (!%p1896_p2), %s1714_s30, 4294966912  ;;  %p14_p3 = scmp.ge.s32.totalorder %s2071_s21, 4   ;;  %s2294_s15 = smov %s1999_s16 }
 0x1c3   : > { %s2295_s16 = smov %s2003_s17  ;;  %s2296_s17 = smov %s2082_s24 }
 0x1c4   : > { %s2297_s18 = smov %s2071_s21  ;;  %16 = sbr.rel (!%p14_p3) target bundleno = 3 (0x3), region = 79 }
 0x1cb   :  { %1719 = vsyncpa [#allocation3], 1 }
 0x1cc   :  { %1721 = vsyncpa [#allocation3 + $0x1], 1 }

</bundles_post_ra>
